<compile_context>
chip_gen: v5e
topology: v5e:2x2
jax: 0.10.0
libtpu: 0.0.40
codegen_flags: <defaults>
</compile_context>

<pallas_src>
import functools

import jax
import jax.numpy as jnp
from jax.experimental import pallas as pl
from jax.experimental.pallas import tpu as pltpu

EPS = 1e-5


def _round_up(x, m):
    return (x + m - 1) // m * m


def _vmem_caps():
    """(tile-search budget, declared vmem_limit cap) from physical VMEM per TensorCore."""
    try:
        cap = int(pltpu.get_tpu_info().vmem_capacity_bytes)
    except Exception:
        cap = 64 << 20  # conservative fallback (v7x has 64 MiB per TensorCore)
    cap = min(cap, 128 << 20)
    limit_cap = max(cap - (12 << 20), 16 << 20)    # headroom for compiler-internal scratch
    budget = max(int(limit_cap * 0.70), 12 << 20)  # pick tiles well under the limit
    return budget, limit_cap


def _pick_dc(rows, d_pad, itemsize, vmem_budget_bytes, target_tiles=4):
    """Channel tile: multiple of 128 dividing d_pad, fitting VMEM, preferring a grid of
    >= target_tiles steps (pipelining / v7x dual-TC) while keeping tiles >= 512 lanes.
    Returns None if even a 128-lane tile does not fit (caller falls back to two-pass)."""
    k = d_pad // 128
    # Bytes per lane-column: double-buffered in + out tiles plus ~one f32 working tile
    # for the streamed stats / epilogue, plus small per-column constants.
    per_col = rows * (4 * itemsize + 4) + 64
    fitting = [m * 128 for m in range(1, k + 1)
               if k % m == 0 and (m * 128) * per_col <= vmem_budget_bytes]
    if not fitting:
        return None
    cap = max(512, d_pad // target_tiles)
    good = [d for d in fitting if d <= cap]
    return max(good) if good else min(fitting)


# --------------------------------------------------------------------------------------
# Single-pass kernel: whole batch resident per channel tile.
# --------------------------------------------------------------------------------------
def _bn1d_single_kernel(x_ref, gb_ref, o_ref, *, bf16_epilogue):
    # x_ref : (N, dc)      -- full batch for one channel tile (reduce over axis 0)
    # gb_ref: (T, 2, dc)   -- resident gamma/beta table; row j belongs to this tile
    j = pl.program_id(0)
    n = x_ref.shape[0]
    inv_n = 1.0 / n

    gb = gb_ref[j]                        # (2, dc) f32
    gamma = gb[0:1, :]
    beta = gb[1:2, :]

    # Streamed stats: re-read the VMEM tile instead of binding one persistent f32 copy.
    mean = jnp.sum(x_ref[...].astype(jnp.float32), axis=0, keepdims=True) * inv_n
    d = x_ref[...].astype(jnp.float32) - mean
    var = jnp.sum(d * d, axis=0, keepdims=True) * inv_n      # biased, centered (stable)
    inv = jax.lax.rsqrt(var + EPS)

    scale = inv * gamma                   # fold normalize + affine
    shift = beta - mean * scale

    if bf16_epilogue and o_ref.dtype == jnp.bfloat16:
        o_ref[...] = x_ref[...] * scale.astype(jnp.bfloat16) + shift.astype(jnp.bfloat16)
    else:
        o_ref[...] = (x_ref[...].astype(jnp.float32) * scale + shift).astype(o_ref.dtype)


def _bn1d_single_pass(x2, gamma32, beta32, N, Dp, dc, itemsize, limit_cap, bf16_epilogue):
    T = Dp // dc
    gb = jnp.stack([gamma32.reshape(T, dc), beta32.reshape(T, dc)], axis=1)  # (T, 2, dc)

    est = 4 * N * dc * itemsize      # double-buffered in + out tiles
    est += 2 * N * dc * 4            # transient f32 working tiles (cast / centered diff)
    est += 2 * gb.size * 4           # resident gamma/beta table
    est += 2 << 20                   # slack
    vmem_limit = int(min(max(est, 16 << 20), limit_cap))

    return pl.pallas_call(
        functools.partial(_bn1d_single_kernel, bf16_epilogue=bf16_epilogue),
        out_shape=jax.ShapeDtypeStruct((N, Dp), x2.dtype),
        grid_spec=pltpu.PrefetchScalarGridSpec(
            num_scalar_prefetch=0,
            grid=(T,),
            in_specs=[
                pl.BlockSpec((N, dc), lambda j: (0, j)),
                pl.BlockSpec((T, 2, dc), lambda j: (0, 0, 0)),   # constant -> fetched once
            ],
            out_specs=pl.BlockSpec((N, dc), lambda j: (0, j)),
        ),
        compiler_params=pltpu.CompilerParams(
            dimension_semantics=("parallel",),
            vmem_limit_bytes=vmem_limit,
        ),
    )(x2, gb)


# --------------------------------------------------------------------------------------
# Two-pass fallback for batches too large to keep (N, 128) resident.
# --------------------------------------------------------------------------------------
def _bn1d_stats_kernel(x_ref, stat_ref, *, tn, n_total):
    # grid = (channel tiles, batch tiles); batch (reduction) axis is last.
    i = pl.program_id(1)

    @pl.when(i == 0)
    def _init():
        stat_ref[...] = jnp.zeros_like(stat_ref)

    x = x_ref[...].astype(jnp.float32)                       # (tn, dc)
    if n_total % tn != 0:
        row = i * tn + jax.lax.broadcasted_iota(jnp.int32, x.shape, 0)
        x = jnp.where(row < n_total, x, 0.0)                 # mask the padded tail rows
    stat_ref[0:1, :] += jnp.sum(x, axis=0, keepdims=True)
    stat_ref[1:2, :] += jnp.sum(x * x, axis=0, keepdims=True)


def _bn1d_apply_kernel(x_ref, sc_ref, o_ref, *, bf16_epilogue):
    # sc_ref: (T, 2, dc) resident scale/shift table.
    j = pl.program_id(1)
    sc = sc_ref[j]                                           # (2, dc) f32
    scale = sc[0:1, :]
    shift = sc[1:2, :]
    if bf16_epilogue and o_ref.dtype == jnp.bfloat16:
        o_ref[...] = x_ref[...] * scale.astype(jnp.bfloat16) + shift.astype(jnp.bfloat16)
    else:
        o_ref[...] = (x_ref[...].astype(jnp.float32) * scale + shift).astype(o_ref.dtype)


def _bn1d_two_pass(x2, gamma32, beta32, N, Dp, itemsize, budget, limit_cap,
                   dc=None, tn=None, bf16_epilogue=False):
    if tn is None:
        tn = min(512, _round_up(N, 8))
    tn = max(8, _round_up(int(tn), 8))
    if dc is None:
        dc = _pick_dc(tn, Dp, itemsize, budget) or 128
    assert dc % 128 == 0 and Dp % dc == 0
    T = Dp // dc
    gn = pl.cdiv(N, tn)

    # ---- pass 1: per-channel sum and sum-of-squares (revisited f32 accumulator) ------
    est1 = 2 * tn * dc * itemsize + 2 * tn * dc * 4 + 4 * 2 * dc * 4 + (2 << 20)
    vmem1 = int(min(max(est1, 16 << 20), limit_cap))
    stats = pl.pallas_call(
        functools.partial(_bn1d_stats_kernel, tn=tn, n_total=N),
        out_shape=jax.ShapeDtypeStruct((2, Dp), jnp.float32),
        grid_spec=pltpu.PrefetchScalarGridSpec(
            num_scalar_prefetch=0,
            grid=(T, gn),                                        # reduction axis last
            in_specs=[pl.BlockSpec((tn, dc), lambda j, i: (i, j))],
            out_specs=pl.BlockSpec((2, dc), lambda j, i: (0, j)),  # revisited accumulator
        ),
        compiler_params=pltpu.CompilerParams(
            dimension_semantics=("parallel", "arbitrary"),
            vmem_limit_bytes=vmem1,
        ),
    )(x2)

    inv_n = 1.0 / N
    mean = stats[0] * inv_n
    # TODO(synk): E[x^2]-mean^2 here keeps the stats pass to a single HBM sweep; it is less
    # stable than the centered form used in the single-pass kernel when |mean| >> std.
    var = jnp.maximum(stats[1] * inv_n - mean * mean, 0.0)
    inv = jax.lax.rsqrt(var + EPS)
    scale = inv * gamma32
    shift = beta32 - mean * scale
    sc = jnp.stack([scale.reshape(T, dc), shift.reshape(T, dc)], axis=1)  # (T, 2, dc)

    # ---- pass 2: y = x * scale + shift ------------------------------------------------
    est2 = 4 * tn * dc * itemsize + 2 * tn * dc * 4 + 2 * sc.size * 4 + (2 << 20)
    vmem2 = int(min(max(est2, 16 << 20), limit_cap))
    return pl.pallas_call(
        functools.partial(_bn1d_apply_kernel, bf16_epilogue=bf16_epilogue),
        out_shape=jax.ShapeDtypeStruct((N, Dp), x2.dtype),
        grid_spec=pltpu.PrefetchScalarGridSpec(
            num_scalar_prefetch=0,
            grid=(gn, T),
            in_specs=[
                pl.BlockSpec((tn, dc), lambda i, j: (i, j)),
                pl.BlockSpec((T, 2, dc), lambda i, j: (0, 0, 0)),  # resident table
            ],
            out_specs=pl.BlockSpec((tn, dc), lambda i, j: (i, j)),
        ),
        compiler_params=pltpu.CompilerParams(
            dimension_semantics=("parallel", "parallel"),
            vmem_limit_bytes=vmem2,
        ),
    )(x2, sc)


# --------------------------------------------------------------------------------------
# Public wrapper (matches the PyTorch module's forward: x.view(-1, dim) -> BN -> view back)
# --------------------------------------------------------------------------------------
def batch_norm_1d(x, gamma=None, beta=None, *, dc=None, tn=None,
                  vmem_budget_bytes=None, bf16_epilogue=None, force_two_pass=False):
    """Training-mode batch norm over the last axis of x; all leading axes are batch."""
    orig_shape = x.shape
    D = orig_shape[-1]
    x2 = x.reshape(-1, D)
    N = x2.shape[0]

    if gamma is None:
        gamma = jnp.ones((D,), jnp.float32)
    if beta is None:
        beta = jnp.zeros((D,), jnp.float32)
    gamma32 = gamma.astype(jnp.float32).reshape(D)
    beta32 = beta.astype(jnp.float32).reshape(D)

    # Pad channels to a lane-aligned width; zero columns normalize to zero and are sliced off.
    Dp = _round_up(D, 128)
    if Dp != D:
        x2 = jnp.pad(x2, ((0, 0), (0, Dp - D)))
        gamma32 = jnp.pad(gamma32, (0, Dp - D))
        beta32 = jnp.pad(beta32, (0, Dp - D))

    itemsize = jnp.dtype(x2.dtype).itemsize
    budget_default, limit_cap = _vmem_caps()
    budget = budget_default if vmem_budget_bytes is None else int(vmem_budget_bytes)
    if bf16_epilogue is None:
        bf16_epilogue = (x2.dtype == jnp.bfloat16)

    use_two_pass = force_two_pass
    if not use_two_pass:
        if dc is None:
            dc = _pick_dc(N, Dp, itemsize, budget)
            if dc is None:
                use_two_pass = True      # even an (N, 128) tile does not fit VMEM
        else:
            assert dc % 128 == 0 and Dp % dc == 0, "dc must be a multiple of 128 dividing D"

    if not use_two_pass:
        out = _bn1d_single_pass(x2, gamma32, beta32, N, Dp, dc, itemsize,
                                limit_cap, bf16_epilogue)
    else:
        out = _bn1d_two_pass(x2, gamma32, beta32, N, Dp, itemsize, budget, limit_cap,
                             dc=dc, tn=tn, bf16_epilogue=bf16_epilogue)

    if Dp != D:
        out = out[:, :D]
    return out.reshape(orig_shape)


# --------------------------------------------------------------------------------------
def _reference(x, gamma, beta):
    x2 = x.reshape(-1, x.shape[-1]).astype(jnp.float32)
    mean = jnp.mean(x2, axis=0, keepdims=True)
    var = jnp.mean((x2 - mean) ** 2, axis=0, keepdims=True)
    y = ((x2 - mean) * jax.lax.rsqrt(var + EPS)
         * gamma[None, :].astype(jnp.float32) + beta[None, :].astype(jnp.float32))
    return y.reshape(x.shape).astype(jnp.float32)


if __name__ == "__main__":
    key = jax.random.PRNGKey(0)
    kx, kg, kb = jax.random.split(key, 3)

    def check(name, N, D, dtype, atol, rtol, **kw):
        x = (jax.random.normal(kx, (N, D), dtype=jnp.float32) + 3.0).astype(dtype)
        gamma = 1.0 + 0.1 * jax.random.normal(kg, (D,), dtype=jnp.float32)
        beta = 0.1 * jax.random.normal(kb, (D,), dtype=jnp.float32)
        out = jax.block_until_ready(batch_norm_1d(x, gamma, beta, **kw))
        ref = _reference(x, gamma, beta)
        assert jnp.allclose(out.astype(jnp.float32), ref, atol=atol, rtol=rtol), \
            f"{name}: mismatch vs reference"

    # 1) default single-pass path (auto-sized channel tile)
    check("single_auto", 8, 256, jnp.float32, 1e-4, 1e-4)
    # 2) multi-step channel grid + resident gamma/beta table indexing
    check("single_dc128", 16, 512, jnp.float32, 1e-4, 1e-4, dc=128)
    # 3) large-N two-pass fallback, with a partial batch tile exercising the row mask
    check("two_pass", 20, 256, jnp.float32, 1e-4, 1e-4, force_two_pass=True, tn=8)
    # 4) channel count that is not a multiple of 128 (lane-padding path)
    check("pad_lanes", 8, 200, jnp.float32, 1e-4, 1e-4)
    # 5) bf16 input with bf16 epilogue (stats in f32)
    check("bf16", 16, 256, jnp.bfloat16, 1e-1, 5e-2)

    print("KERNEL_OK")
</pallas_src>

<mosaic_0001>
module attributes {stable_mosaic.version = 11 : i64} {
  func.func @_bn1d_single_kernel(%arg0: i32, %arg1: memref<8x256xf32, #tpu.memory_space<vmem>>, %arg2: memref<1x2x256xf32, #tpu.memory_space<vmem>>, %arg3: memref<8x256xf32, #tpu.memory_space<vmem>>) attributes {dimension_semantics = [#tpu.dimension_semantics<parallel>], iteration_bounds = array<i64: 1>, scalar_prefetch = 0 : i64, scratch_operands = 0 : i64, tpu.core_type = #tpu.core_type<tc>, window_params = [{transform_indices = @transform_0, window_bounds = array<i64: 8, 256>}, {pipeline_mode = #tpu.pipeline_mode<synchronous>, transform_indices = @transform_1, window_bounds = array<i64: 1, 2, 256>}, {transform_indices = @transform_2, window_bounds = array<i64: 8, 256>}]} {
    %0 = arith.index_cast %arg0 : i32 to index
    %c0 = arith.constant 0 : index
    %c0_0 = arith.constant 0 : index
    %1 = vector.load %arg2[%0, %c0, %c0_0] : memref<1x2x256xf32, #tpu.memory_space<vmem>>, vector<1x2x256xf32>
    %2 = vector.shape_cast %1 : vector<1x2x256xf32> to vector<2x256xf32>
    %3 = vector.extract_strided_slice %2 {offsets = [0, 0], sizes = [1, 256], strides = [1, 1]} : vector<2x256xf32> to vector<1x256xf32>
    %4 = vector.extract_strided_slice %2 {offsets = [1, 0], sizes = [1, 256], strides = [1, 1]} : vector<2x256xf32> to vector<1x256xf32>
    %c0_1 = arith.constant 0 : index
    %c0_2 = arith.constant 0 : index
    %5 = vector.load %arg1[%c0_1, %c0_2] : memref<8x256xf32, #tpu.memory_space<vmem>>, vector<8x256xf32>
    %cst = arith.constant dense<0.000000e+00> : vector<256xf32>
    %6 = vector.multi_reduction <add>, %5, %cst [0] : vector<8x256xf32> to vector<256xf32>
    %7 = vector.shape_cast %6 : vector<256xf32> to vector<1x256xf32>
    %cst_3 = arith.constant 1.250000e-01 : f32
    %8 = vector.broadcast %cst_3 : f32 to vector<1x256xf32>
    %9 = arith.mulf %7, %8 : vector<1x256xf32>
    %c0_4 = arith.constant 0 : index
    %c0_5 = arith.constant 0 : index
    %10 = vector.load %arg1[%c0_4, %c0_5] : memref<8x256xf32, #tpu.memory_space<vmem>>, vector<8x256xf32>
    %11 = vector.broadcast %9 : vector<1x256xf32> to vector<8x256xf32>
    %12 = arith.subf %10, %11 : vector<8x256xf32>
    %13 = arith.mulf %12, %12 : vector<8x256xf32>
    %cst_6 = arith.constant dense<0.000000e+00> : vector<256xf32>
    %14 = vector.multi_reduction <add>, %13, %cst_6 [0] : vector<8x256xf32> to vector<256xf32>
    %15 = vector.shape_cast %14 : vector<256xf32> to vector<1x256xf32>
    %cst_7 = arith.constant 1.250000e-01 : f32
    %16 = vector.broadcast %cst_7 : f32 to vector<1x256xf32>
    %17 = arith.mulf %15, %16 : vector<1x256xf32>
    %cst_8 = arith.constant 9.99999974E-6 : f32
    %18 = vector.broadcast %cst_8 : f32 to vector<1x256xf32>
    %19 = arith.addf %17, %18 : vector<1x256xf32>
    %20 = math.rsqrt %19 : vector<1x256xf32>
    %21 = arith.mulf %20, %3 : vector<1x256xf32>
    %22 = arith.mulf %9, %21 : vector<1x256xf32>
    %23 = arith.subf %4, %22 : vector<1x256xf32>
    %c0_9 = arith.constant 0 : index
    %c0_10 = arith.constant 0 : index
    %24 = vector.load %arg1[%c0_9, %c0_10] : memref<8x256xf32, #tpu.memory_space<vmem>>, vector<8x256xf32>
    %25 = vector.broadcast %21 : vector<1x256xf32> to vector<8x256xf32>
    %26 = arith.mulf %24, %25 : vector<8x256xf32>
    %27 = vector.broadcast %23 : vector<1x256xf32> to vector<8x256xf32>
    %28 = arith.addf %26, %27 : vector<8x256xf32>
    %c0_11 = arith.constant 0 : index
    %c0_12 = arith.constant 0 : index
    %29 = vector.load %arg3[%c0_11, %c0_12] : memref<8x256xf32, #tpu.memory_space<vmem>>, vector<8x256xf32>
    tpu.vector_store %arg3[%c0_11, %c0_12], %28 {strides = array<i32>} : memref<8x256xf32, #tpu.memory_space<vmem>>, vector<8x256xf32>,
    return
  }
  func.func @transform_0(%arg0: i32) -> (i32, i32) {
    %c0_i32 = arith.constant 0 : i32
    %c0_i32_0 = arith.constant 0 : i32
    return %c0_i32, %arg0 : i32, i32
  }
  func.func @transform_1(%arg0: i32) -> (i32, i32, i32) {
    %c0_i32 = arith.constant 0 : i32
    %c0_i32_0 = arith.constant 0 : i32
    %c0_i32_1 = arith.constant 0 : i32
    %c0_i32_2 = arith.constant 0 : i32
    return %c0_i32, %c0_i32_0, %c0_i32_1 : i32, i32, i32
  }
  func.func @transform_2(%arg0: i32) -> (i32, i32) {
    %c0_i32 = arith.constant 0 : i32
    %c0_i32_0 = arith.constant 0 : i32
    return %c0_i32, %arg0 : i32, i32
  }
}

</mosaic_0001>

<bundles_post_ra>
// kernel: tpu_custom_call.1
= control target key start
LH: loop header
LB: loop body
LE: loop exit
PB: predicated region body
PF: predicated region fallthrough
CT: control target
= control target key end

     0   :  { %7 = vsyncpa [#allocation3], 0  ;;  %s274_s0 = inlined_call_operand.hbm [shape: f32[8,256], index: 0, kind: input, shape index: {}]   ;;  %s275_s1 = inlined_call_operand.hbm [shape: f32[1,2,256], index: 1, kind: input, shape index: {}]   ;;  %s276_s2 = inlined_call_operand.hbm [shape: f32[8,256], index: 2, kind: output, shape index: {}]  }
   0x1   :  { %8 = vsyncpa [#allocation6], 0 }
   0x2   :  { %9 = vsyncpa [#allocation4], 0  ;;  %s15_s11 = sshll.u32 %s274_s0, 4  ;;  %s235_s12 = smov [#allocation2]   ;;  %s16_s11 = int_to_ptr.hbm [resolvable:$true] %s15_s11 }
   0x3   :  { %s17_s13 = sshll.u32 %s235_s12, 4  ;;  %s26_s16 = sshll.u32 %s275_s1, 4  ;;  %s18_s13 = int_to_ptr.vmem [resolvable:$true] %s17_s13  ;;  %s27_s16 = int_to_ptr.hbm [resolvable:$true] %s26_s16 }
   0x4   :  { %20 = dma.hbm_to_vmem [thread:$0]  %s16_s11, 256, %s18_s13, [#allocation3]  }
   0x5   :  { %s236_s17 = smov [#allocation5]  }
   0x6   :  { %s28_s18 = sshll.u32 %s236_s17, 4  ;;  %s29_s18 = int_to_ptr.vmem [resolvable:$true] %s28_s18 }
   0x7   :  { %31 = dma.hbm_to_vmem [thread:$0]  %s27_s16, 64, %s29_s18, [#allocation6]  }
   0x8   :  { %229 = dma.done.wait [#allocation3], 256  }
   0x9   :  { %230 = vsyncadd [#allocation3], 4294967040 }
   0xa   :  { %231 = dma.done.wait [#allocation6], 64  }
   0xb   :  { %232 = vsyncadd [#allocation6], 4294967232  ;;  %v259_v0 = vld [vmem:[#allocation2] sm:$0xff]  ;;  %v261_v1 = vld [vmem:[#allocation2 + $0x8] sm:$0xff]  ;;  %vm112_vm6 = vcmask 1041408   ;;  %s237_s0 = smov [#allocation7]  }
   0xc   :  { %v46_v2 = vrot.slane %v259_v0, 4  ;;  %v52_v3 = vrot.slane %v261_v1, 4  ;;  %v43_v43 = vld [vmem:[#allocation5] sm:$0xf]  ;;  %s137_s1 = sshll.u32 %s237_s0, 4  ;;  %s139_s21 = sshll.u32 %s276_s2, 4  ;;  %s138_s1 = int_to_ptr.vmem [resolvable:$true] %s137_s1  ;;  %s140_s21 = int_to_ptr.hbm [resolvable:$true] %s139_s21 }
   0xd   :  { %v101_v47 = vperm.slane %v43_v43, 0  ;;  %v102_v49 = vperm.slane %v43_v43, 2 }
   0xe   :  { %v47_v4 = vadd.f32 %v46_v2, %v259_v0  ;;  %v53_v5 = vadd.f32 %v52_v3, %v261_v1 }
  0x10   :  { %v48_v6 = vrot.slane %v47_v4, 2  ;;  %v54_v7 = vrot.slane %v53_v5, 2 }
  0x12   :  { %v49_v8 = vadd.f32 %v48_v6, %v47_v4  ;;  %v55_v9 = vadd.f32 %v54_v7, %v53_v5 }
  0x14   :  { %v50_v10 = vrot.slane %v49_v8, 1  ;;  %v56_v11 = vrot.slane %v55_v9, 1 }
  0x16   :  { %v51_v12 = vadd.f32 %v50_v10, %v49_v8  ;;  %v57_v13 = vadd.f32 %v56_v11, %v55_v9 }
  0x18   :  { %v58_v14 = vmul.f32 0.125, %v51_v12  ;;  %v59_v15 = vmul.f32 0.125, %v57_v13 }
  0x1a   :  { %v60_v16 = vsub.f32 %v259_v0, %v58_v14  ;;  %v61_v17 = vsub.f32 %v261_v1, %v59_v15 }
  0x1c   :  { %v62_v18 = vmul.f32 %v60_v16, %v60_v16  ;;  %v63_v19 = vmul.f32 %v61_v17, %v61_v17 }
  0x1e   :  { %v64_v20 = vrot.slane %v62_v18, 4  ;;  %v70_v21 = vrot.slane %v63_v19, 4 }
  0x20   :  { %v65_v22 = vadd.f32 %v64_v20, %v62_v18  ;;  %v71_v23 = vadd.f32 %v70_v21, %v63_v19 }
  0x22   :  { %v66_v24 = vrot.slane %v65_v22, 2  ;;  %v72_v25 = vrot.slane %v71_v23, 2 }
  0x24   :  { %v67_v26 = vadd.f32 %v66_v24, %v65_v22  ;;  %v73_v27 = vadd.f32 %v72_v25, %v71_v23 }
  0x26   :  { %v68_v28 = vrot.slane %v67_v26, 1  ;;  %v74_v29 = vrot.slane %v73_v27, 1 }
  0x28   :  { %v69_v30 = vadd.f32 %v68_v28, %v67_v26  ;;  %v75_v31 = vadd.f32 %v74_v29, %v73_v27 }
  0x2a   :  { %v76_v32 = vmul.f32 0.125, %v69_v30  ;;  %v77_v33 = vmul.f32 0.125, %v75_v31 }
  0x2c   :  { %v78_v34 = vadd.f32 1e-05, %v76_v32  ;;  %v79_v35 = vadd.f32 1e-05, %v77_v33 }
  0x2e   :  { %153 = vrsqrt.f32 %v78_v34  ;;  %vm86_vm0 = vweird.f32 %v78_v34  ;;  %vm96_vm2 = vweird.f32 %v79_v35 }
  0x2f   :  { %155 = vrsqrt.f32 %v79_v35 }
  0x34   :  { %v154_v36 = vpop.eup %153 }
  0x35   :  { %v156_v37 = vpop.eup %155  ;;  %v81_v38 = vmul.f32 %v154_v36, %v78_v34  ;;  %vm87_vm1 = vweird.f32 %v154_v36 }
  0x36   :  { %v91_v39 = vmul.f32 %v156_v37, %v79_v35  ;;  %vm97_vm3 = vweird.f32 %v156_v37  ;;  %vm88_vm4 = vmor %vm86_vm0, %vm87_vm1 }
  0x37   :  { %v82_v40 = vmul.f32 %v154_v36, %v81_v38  ;;  %vm98_vm5 = vmor %vm96_vm2, %vm97_vm3 }
  0x38   :  { %v92_v41 = vmul.f32 %v156_v37, %v91_v39 }
  0x39   :  { %v83_v42 = vmul.f32 0.5, %v82_v40 }
  0x3a   :  { %v93_v44 = vmul.f32 0.5, %v92_v41 }
  0x3b   :  { %v84_v45 = vsub.f32 1.5, %v83_v42 }
  0x3c   :  { %v94_v46 = vsub.f32 1.5, %v93_v44 }
  0x3d   :  { %v85_v48 = vmul.f32 %v154_v36, %v84_v45 }
  0x3e   :  { %v95_v50 = vmul.f32 %v156_v37, %v94_v46 }
  0x3f   :  { %v89_v51 = vsel %vm88_vm4, %v154_v36, %v85_v48 }
  0x40   :  { %v99_v52 = vsel %vm98_vm5, %v156_v37, %v95_v50  ;;  %v105_v53 = vmul.f32 %v101_v47, %v89_v51 }
  0x41   :  { %v106_v54 = vmul.f32 %v102_v49, %v99_v52 }
  0x42   :  { %v107_v55 = vmul.f32 %v105_v53, %v58_v14  ;;  %v117_v60 = vperm.slane %v105_v53, 0 }
  0x43   :  { %v108_v56 = vmul.f32 %v106_v54, %v59_v15  ;;  %v118_v61 = vperm.slane %v106_v54, 0 }
  0x44   :  { %v119_v63 = vmul.f32 %v117_v60, %v259_v0 }
  0x45   :  { %v111_v57 = vrot.slane %v108_v56, 6  ;;  %v120_v3 = vmul.f32 %v118_v61, %v261_v1 }
  0x47   :  { %v113_v58 = vsel %vm112_vm6, %v107_v55, %v111_v57 }
  0x48   :  { %v114_v59 = vrot.slane %v113_v58, 7 }
  0x4a   :  { %v116_v62 = vsub.f32 %v43_v43, %v114_v59 }
  0x4c   :  { %v122_v2 = vperm.slane %v116_v62, 1  ;;  %v123_v4 = vperm.slane %v116_v62, 3 }
  0x4e   :  { %v126_v5 = vperm.slane %v122_v2, 1  ;;  %v127_v6 = vperm.slane %v123_v4, 1 }
  0x50   :  { %v128_v7 = vadd.f32 %v126_v5, %v119_v63  ;;  %v129_v8 = vadd.f32 %v127_v6, %v120_v3 }
  0x52   :  { %130 = vst [vmem:[#allocation7] sm:$0xff] %v128_v7 }
  0x53   :  { %131 = vst [vmem:[#allocation7 + $0x8] sm:$0xff] %v129_v8 }
  0x54   :  { %142 = dma.vmem_to_hbm [thread:$0]  %s138_s1, 256, %s140_s21, [#allocation4]  }
  0x55   :  { %233 = dma.done.wait [#allocation4], 256  }
  0x56   :  { %234 = vsyncadd [#allocation4], 4294967040 }
  0x57   :  { %147 = vsyncpa [#allocation3], 1 }
  0x58   :  { %148 = vsyncpa [#allocation6], 1 }
  0x59   :  { %149 = vsyncpa [#allocation4], 1 }

</bundles_post_ra>
